<compile_context>
chip_gen: v7x
topology: tpu7x:2x2x1
jax: 0.10.0
libtpu: 0.0.40
codegen_flags: <defaults>
</compile_context>

<pallas_src>
from functools import partial

import jax
import jax.numpy as jnp
from jax import lax
from jax.experimental import pallas as pl
from jax.experimental.pallas import tpu as pltpu


def conv1d_kernel(x_ref, w_ref, o_ref, *, seq_len, ksize, pad):
    # x_ref: (M, H_in)        M = Bt * seq_len (batch fused into the MXU M dim;
    #                          every block holds whole sequences)
    # w_ref: (K, H_in, H_out) per-tap matmul RHS, resident across all grid steps
    # o_ref: (M, H_out)       true H_out (no lane padding)
    m, _ = x_ref.shape
    h_out = o_ref.shape[-1]
    x = x_ref[...]

    # Position of each row inside its own sequence (rows are [b0 t0..tL-1, b1 t0.., ...]).
    pos = lax.broadcasted_iota(jnp.int32, (m, 1), 0) % seq_len

    acc = jnp.zeros((m, h_out), jnp.float32)
    for k in range(ksize):
        d = k - pad                                   # out[t] += x[t + d] @ W[k]
        # Shift on the XLU; wrap-around / cross-batch rows are exactly the out-of-range
        # rows, which the position mask zeroes (scalar-0 else branch: no zeros temp).
        shifted = x if d == 0 else pltpu.roll(x, shift=(-d) % m, axis=0)
        valid = jnp.logical_and(pos + d >= 0, pos + d < seq_len)
        xk = jnp.where(valid, shifted, 0.0)
        acc = acc + jnp.dot(xk, w_ref[k], preferred_element_type=jnp.float32)

    o_ref[...] = acc.astype(o_ref.dtype)


def _pick_batch_tile(B, L, m_target, row_align, min_steps=4):
    """Pick Bt (sequences per grid step). Blocks always hold whole sequences so the
    in-kernel roll+mask boundary handling stays exact. Prefers blocks near m_target
    fused rows; when the problem is big enough, keeps >= min_steps grid steps so both
    v7x TensorCores get >=2 pipelined steps each (harmless on 1-TC v5e/v6e)."""
    cands = [bt for bt in range(1, B + 1)
             if B % bt == 0 and ((bt * L) % row_align == 0 or bt == B)]
    fits = [bt for bt in cands if bt * L <= m_target]
    if not fits:
        # A single sequence already exceeds the target.
        # TODO(synk): tile the seq axis with a (K-1) halo instead of taking one huge block.
        return min(cands)
    if B * L >= min_steps * m_target:
        piped = [bt for bt in fits if B // bt >= min_steps]
        if piped:
            return max(piped)
    return max(fits)


def cnn_forward(x, weight, *, m_target=4096, compute_dtype=None):
    """x: (B, L, H) ; weight: (H_out, H_in, K) as in nn.Conv1d(bias=False, padding=same)."""
    B, L, H_in = x.shape
    H_out, H_in_w, K = weight.shape
    assert H_in == H_in_w
    assert K % 2 == 1, "PyTorch 'same' padding via (K-1)//2 requires odd kernel_size"
    pad = (K - 1) // 2

    # (H_out, H_in, K) -> (K, H_in, H_out): tap k is a ready (H_in, H_out) matmul RHS.
    w = jnp.transpose(weight, (2, 1, 0))

    # Flatten batch/seq (free reshape) so batch fuses into the matmul M dimension.
    xf = x.reshape(B * L, H_in)

    if compute_dtype is not None:      # e.g. jnp.bfloat16 where accuracy allows (~2x bytes)
        xf = xf.astype(compute_dtype)
        w = w.astype(compute_dtype)
    out_dtype = compute_dtype if compute_dtype is not None else x.dtype

    isz = jnp.dtype(xf.dtype).itemsize
    osz = jnp.dtype(out_dtype).itemsize
    # Packed sublane tile: (8,128) f32, (16,128) bf16, (32,128) int8/fp8.
    row_align = max(8, 32 // isz)

    # VMEM budget per step: double-buffered in/out blocks + K shifted copies + f32 accum.
    # Keep well under v7x's 64 MiB physical VMEM.
    bytes_per_row = 2 * H_in * isz + 2 * H_out * osz + K * H_in * isz + H_out * 4
    vmem_budget = 24 << 20
    m_cap = max(row_align, (vmem_budget // bytes_per_row) // row_align * row_align)

    Bt = _pick_batch_tile(B, L, min(m_target, m_cap), row_align)
    M_blk = Bt * L
    grid = (B // Bt,)

    w_bytes = w.size * isz
    need = (2 * (M_blk * H_in * isz + M_blk * H_out * osz)   # double-buffered in/out
            + 2 * w_bytes                                     # resident weights
            + M_blk * (K * H_in * isz + H_out * 4))           # shifted copies + f32 accum
    vmem_limit = int(min(max(need + (8 << 20), 32 << 20), 64 << 20))

    cost = pl.CostEstimate(
        flops=2 * B * L * K * H_in * H_out,
        transcendentals=0,
        bytes_accessed=xf.size * isz + w.size * isz + B * L * H_out * osz)

    kernel = partial(conv1d_kernel, seq_len=L, ksize=K, pad=pad)
    out = pl.pallas_call(
        kernel,
        out_shape=jax.ShapeDtypeStruct((B * L, H_out), out_dtype),
        grid_spec=pltpu.PrefetchScalarGridSpec(
            num_scalar_prefetch=0,
            grid=grid,
            in_specs=[
                # Bt whole sequences of the (unpadded) input per grid step.
                pl.BlockSpec((M_blk, H_in), lambda i: (i, 0)),
                # Full per-tap weight stack, resident every step.
                pl.BlockSpec((K, H_in, H_out), lambda i: (0, 0, 0)),
            ],
            # True H_out last dim (== full array dim): no padded writes, no wrapper slice.
            out_specs=pl.BlockSpec((M_blk, H_out), lambda i: (i, 0)),
        ),
        compiler_params=pltpu.CompilerParams(
            dimension_semantics=("parallel",),
            vmem_limit_bytes=vmem_limit),
        cost_estimate=cost,
    )(xf, w)

    return out.reshape(B, L, H_out)


if __name__ == "__main__":
    # config = {'hidden_size': 32, 'kernel_size': 3}
    hidden_size = 32
    kernel_size = 3
    batch = 2
    seq = 8
    pad = (kernel_size - 1) // 2

    key = jax.random.PRNGKey(0)
    kx, kw = jax.random.split(key)
    x = jax.random.normal(kx, (batch, seq, hidden_size), dtype=jnp.float32)
    # Conv1d weight: (out_channels, in_channels, kernel_size), no bias.
    weight = jax.random.normal(
        kw, (hidden_size, hidden_size, kernel_size), dtype=jnp.float32) * 0.1

    out = cnn_forward(x, weight)
    out = jax.block_until_ready(out)

    # Reference: same math via lax conv (mirrors nn.Conv1d on the transposed input).
    ref = lax.conv_general_dilated(
        jnp.transpose(x, (0, 2, 1)), weight,
        window_strides=(1,), padding=[(pad, pad)],
        dimension_numbers=("NCH", "OIH", "NCH"))
    ref = jnp.transpose(ref, (0, 2, 1))
    assert out.shape == (batch, seq, hidden_size)
    assert jnp.allclose(out, ref, atol=1e-4, rtol=1e-4)

    print("KERNEL_OK")
</pallas_src>

<mosaic_0001>
module attributes {stable_mosaic.version = 11 : i64} {
  func.func @conv1d_kernel(%arg0: i32, %arg1: memref<16x32xf32, #tpu.memory_space<vmem>>, %arg2: memref<3x32x32xf32, #tpu.memory_space<vmem>>, %arg3: memref<16x32xf32, #tpu.memory_space<vmem>>) attributes {dimension_semantics = [#tpu.dimension_semantics<parallel>], iteration_bounds = array<i64: 1>, scalar_prefetch = 0 : i64, scratch_operands = 0 : i64, tpu.core_type = #tpu.core_type<tc>, window_params = [{transform_indices = @transform_0, window_bounds = array<i64: 16, 32>}, {pipeline_mode = #tpu.pipeline_mode<synchronous>, transform_indices = @transform_1, window_bounds = array<i64: 3, 32, 32>}, {transform_indices = @transform_2, window_bounds = array<i64: 16, 32>}]} {
    %c0 = arith.constant 0 : index
    %c0_0 = arith.constant 0 : index
    %0 = vector.load %arg1[%c0, %c0_0] : memref<16x32xf32, #tpu.memory_space<vmem>>, vector<16x32xf32>
    %1 = tpu.iota {dimensions = array<i32: 0>} : vector<16x1xi32>
    %c8_i32 = arith.constant 8 : i32
    %c0_i32 = arith.constant 0 : i32
    %2 = arith.cmpi eq, %c8_i32, %c0_i32 : i32
    %c1_i32 = arith.constant 1 : i32
    %3 = arith.select %2, %c1_i32, %c8_i32 : i32
    %4 = vector.broadcast %3 : i32 to vector<16x1xi32>
    %5 = arith.remsi %1, %4 : vector<16x1xi32>
    %c0_i32_1 = arith.constant 0 : i32
    %6 = vector.broadcast %c0_i32_1 : i32 to vector<16x1xi32>
    %7 = arith.cmpi ne, %5, %6 : vector<16x1xi32>
    %c0_i32_2 = arith.constant 0 : i32
    %8 = vector.broadcast %c0_i32_2 : i32 to vector<16x1xi32>
    %9 = arith.cmpi slt, %5, %8 : vector<16x1xi32>
    %c0_i32_3 = arith.constant 0 : i32
    %10 = arith.cmpi slt, %3, %c0_i32_3 : i32
    %11 = vector.broadcast %10 : i1 to vector<16x1xi1>
    %12 = vector.broadcast %11 : vector<16x1xi1> to vector<16x1xi1>
    %13 = arith.xori %9, %12 : vector<16x1xi1>
    %14 = arith.andi %13, %7 : vector<16x1xi1>
    %15 = vector.broadcast %3 : i32 to vector<16x1xi32>
    %16 = arith.addi %5, %15 : vector<16x1xi32>
    %17 = arith.select %14, %16, %5 : vector<16x1xi1>, vector<16x1xi32>
    %cst = arith.constant 0.000000e+00 : f32
    %18 = vector.broadcast %cst : f32 to vector<16x32xf32>
    %c1_i32_4 = arith.constant 1 : i32
    %19 = tpu.dynamic_rotate %0 by %c1_i32_4 dim 0 : vector<16x32xf32>, i32 -> vector<16x32xf32>
    %c-1_i32 = arith.constant -1 : i32
    %20 = vector.broadcast %c-1_i32 : i32 to vector<16x1xi32>
    %21 = arith.addi %17, %20 : vector<16x1xi32>
    %c0_i32_5 = arith.constant 0 : i32
    %22 = vector.broadcast %c0_i32_5 : i32 to vector<16x1xi32>
    %23 = arith.cmpi sge, %21, %22 : vector<16x1xi32>
    %c-1_i32_6 = arith.constant -1 : i32
    %24 = vector.broadcast %c-1_i32_6 : i32 to vector<16x1xi32>
    %25 = arith.addi %17, %24 : vector<16x1xi32>
    %c8_i32_7 = arith.constant 8 : i32
    %26 = vector.broadcast %c8_i32_7 : i32 to vector<16x1xi32>
    %27 = arith.cmpi slt, %25, %26 : vector<16x1xi32>
    %28 = arith.andi %23, %27 : vector<16x1xi1>
    %cst_8 = arith.constant 0.000000e+00 : f32
    %29 = vector.shape_cast %28 : vector<16x1xi1> to vector<16x1xi1>
    %30 = vector.broadcast %29 : vector<16x1xi1> to vector<16x32xi1>
    %31 = vector.broadcast %cst_8 : f32 to vector<16x32xf32>
    %32 = arith.select %30, %19, %31 : vector<16x32xi1>, vector<16x32xf32>
    %c0_9 = arith.constant 0 : index
    %c0_10 = arith.constant 0 : index
    %c0_11 = arith.constant 0 : index
    %33 = vector.load %arg2[%c0_9, %c0_10, %c0_11] : memref<3x32x32xf32, #tpu.memory_space<vmem>>, vector<1x32x32xf32>
    %34 = vector.shape_cast %33 : vector<1x32x32xf32> to vector<32x32xf32>
    %cst_12 = arith.constant dense<0.000000e+00> : vector<16x32xf32>
    %35 = tpu.matmul %32, %34, %cst_12 {dimension_numbers = #tpu.dot_dimension_numbers<[1], [0], [0], [1], [0, 0, 1, 1], [], []>} : vector<16x32xf32>, vector<32x32xf32>, vector<16x32xf32> -> vector<16x32xf32>
    %36 = arith.addf %18, %35 : vector<16x32xf32>
    %c0_i32_13 = arith.constant 0 : i32
    %37 = vector.broadcast %c0_i32_13 : i32 to vector<16x1xi32>
    %38 = arith.addi %17, %37 : vector<16x1xi32>
    %c0_i32_14 = arith.constant 0 : i32
    %39 = vector.broadcast %c0_i32_14 : i32 to vector<16x1xi32>
    %40 = arith.cmpi sge, %38, %39 : vector<16x1xi32>
    %c0_i32_15 = arith.constant 0 : i32
    %41 = vector.broadcast %c0_i32_15 : i32 to vector<16x1xi32>
    %42 = arith.addi %17, %41 : vector<16x1xi32>
    %c8_i32_16 = arith.constant 8 : i32
    %43 = vector.broadcast %c8_i32_16 : i32 to vector<16x1xi32>
    %44 = arith.cmpi slt, %42, %43 : vector<16x1xi32>
    %45 = arith.andi %40, %44 : vector<16x1xi1>
    %cst_17 = arith.constant 0.000000e+00 : f32
    %46 = vector.shape_cast %45 : vector<16x1xi1> to vector<16x1xi1>
    %47 = vector.broadcast %46 : vector<16x1xi1> to vector<16x32xi1>
    %48 = vector.broadcast %cst_17 : f32 to vector<16x32xf32>
    %49 = arith.select %47, %0, %48 : vector<16x32xi1>, vector<16x32xf32>
    %c1 = arith.constant 1 : index
    %c0_18 = arith.constant 0 : index
    %c0_19 = arith.constant 0 : index
    %50 = vector.load %arg2[%c1, %c0_18, %c0_19] : memref<3x32x32xf32, #tpu.memory_space<vmem>>, vector<1x32x32xf32>
    %51 = vector.shape_cast %50 : vector<1x32x32xf32> to vector<32x32xf32>
    %cst_20 = arith.constant dense<0.000000e+00> : vector<16x32xf32>
    %52 = tpu.matmul %49, %51, %cst_20 {dimension_numbers = #tpu.dot_dimension_numbers<[1], [0], [0], [1], [0, 0, 1, 1], [], []>} : vector<16x32xf32>, vector<32x32xf32>, vector<16x32xf32> -> vector<16x32xf32>
    %53 = arith.addf %36, %52 : vector<16x32xf32>
    %c15_i32 = arith.constant 15 : i32
    %54 = tpu.dynamic_rotate %0 by %c15_i32 dim 0 : vector<16x32xf32>, i32 -> vector<16x32xf32>
    %c1_i32_21 = arith.constant 1 : i32
    %55 = vector.broadcast %c1_i32_21 : i32 to vector<16x1xi32>
    %56 = arith.addi %17, %55 : vector<16x1xi32>
    %c0_i32_22 = arith.constant 0 : i32
    %57 = vector.broadcast %c0_i32_22 : i32 to vector<16x1xi32>
    %58 = arith.cmpi sge, %56, %57 : vector<16x1xi32>
    %c1_i32_23 = arith.constant 1 : i32
    %59 = vector.broadcast %c1_i32_23 : i32 to vector<16x1xi32>
    %60 = arith.addi %17, %59 : vector<16x1xi32>
    %c8_i32_24 = arith.constant 8 : i32
    %61 = vector.broadcast %c8_i32_24 : i32 to vector<16x1xi32>
    %62 = arith.cmpi slt, %60, %61 : vector<16x1xi32>
    %63 = arith.andi %58, %62 : vector<16x1xi1>
    %cst_25 = arith.constant 0.000000e+00 : f32
    %64 = vector.shape_cast %63 : vector<16x1xi1> to vector<16x1xi1>
    %65 = vector.broadcast %64 : vector<16x1xi1> to vector<16x32xi1>
    %66 = vector.broadcast %cst_25 : f32 to vector<16x32xf32>
    %67 = arith.select %65, %54, %66 : vector<16x32xi1>, vector<16x32xf32>
    %c2 = arith.constant 2 : index
    %c0_26 = arith.constant 0 : index
    %c0_27 = arith.constant 0 : index
    %68 = vector.load %arg2[%c2, %c0_26, %c0_27] : memref<3x32x32xf32, #tpu.memory_space<vmem>>, vector<1x32x32xf32>
    %69 = vector.shape_cast %68 : vector<1x32x32xf32> to vector<32x32xf32>
    %cst_28 = arith.constant dense<0.000000e+00> : vector<16x32xf32>
    %70 = tpu.matmul %67, %69, %cst_28 {dimension_numbers = #tpu.dot_dimension_numbers<[1], [0], [0], [1], [0, 0, 1, 1], [], []>} : vector<16x32xf32>, vector<32x32xf32>, vector<16x32xf32> -> vector<16x32xf32>
    %71 = arith.addf %53, %70 : vector<16x32xf32>
    %c0_29 = arith.constant 0 : index
    %c0_30 = arith.constant 0 : index
    %72 = vector.load %arg3[%c0_29, %c0_30] : memref<16x32xf32, #tpu.memory_space<vmem>>, vector<16x32xf32>
    tpu.vector_store %arg3[%c0_29, %c0_30], %71 {strides = array<i32>} : memref<16x32xf32, #tpu.memory_space<vmem>>, vector<16x32xf32>,
    return
  }
  func.func @transform_0(%arg0: i32) -> (i32, i32) {
    %c0_i32 = arith.constant 0 : i32
    %c0_i32_0 = arith.constant 0 : i32
    return %arg0, %c0_i32 : i32, i32
  }
  func.func @transform_1(%arg0: i32) -> (i32, i32, i32) {
    %c0_i32 = arith.constant 0 : i32
    %c0_i32_0 = arith.constant 0 : i32
    %c0_i32_1 = arith.constant 0 : i32
    %c0_i32_2 = arith.constant 0 : i32
    return %c0_i32, %c0_i32_0, %c0_i32_1 : i32, i32, i32
  }
  func.func @transform_2(%arg0: i32) -> (i32, i32) {
    %c0_i32 = arith.constant 0 : i32
    %c0_i32_0 = arith.constant 0 : i32
    return %arg0, %c0_i32 : i32, i32
  }
}

</mosaic_0001>

<bundles_post_ra>
// kernel: tpu_custom_call.1
= control target key start
LH: loop header
LB: loop body
LE: loop exit
PB: predicated region body
PF: predicated region fallthrough
CT: control target
= control target key end

     0   :  { %7 = vsyncpa [#allocation3], 0  ;;  %s639_s0 = inlined_call_operand.hbm [shape: f32[16,32], index: 0, kind: input, shape index: {}]   ;;  %s640_s1 = inlined_call_operand.hbm [shape: f32[3,32,32], index: 1, kind: input, shape index: {}]   ;;  %s641_s2 = inlined_call_operand.hbm [shape: f32[16,32], index: 2, kind: output, shape index: {}]  }
   0x1   :  { %8 = vsyncpa [#allocation6], 0 }
   0x2   :  { %9 = vsyncpa [#allocation4], 0  ;;  %s561_s9 = smov [#allocation2]   ;;  %s489_s13 = scalar_lea.hbm %s639_s0, 256 }
   0x3   :  { %s15_s10 = sshll.u32 %s561_s9, 4  ;;  %p490_p0 = scmp.ne.s32.totalorder %s639_s0, %s489_s13  ;;  %s16_s10 = int_to_ptr.vmem [resolvable:$true] %s15_s10 }
   0x4   :  { %p493_p1 = scmp.lt.u32.totalorder %s489_s13, %s639_s0 }
   0x6   :  { %p495_p2 = pnand %p493_p1, %p490_p0 }
   0x8   :  { %498 = shalt.err (!%p495_p2)
}
   0x9   :  { %s499_s18 = scalar_lea.vmem %s16_s10, 256  ;;  %p504_p4 = scmp.lt.s32.totalorder %s16_s10, %s16_s10 }
   0xa   :  { %p500_p3 = scmp.ne.s32.totalorder %s16_s10, %s499_s18  ;;  %p505_p5 = scmp.lt.s32.totalorder %s499_s18, %s499_s18 }
   0xc   :  { %p506_p6 = por %p505_p5, %p504_p4 }
   0xe   :  { %p507_p7 = pnand %p506_p6, %p500_p3 }
  0x10   :  { %510 = shalt.err (!%p507_p7)
}
  0x11   :  { %s562_s19 = smov 128   ;;  %s563_s20 = smov 8  }
  0x12   :  { %21 = dma.hbm_to_vmem [thread:$0]  %s639_s0, 256, %s16_s10, [#allocation3], %s562_s19, %s562_s19, %s563_s20  }
  0x13   :  { %s564_s23 = smov [#allocation5]   ;;  %s511_s27 = scalar_lea.hbm %s640_s1, 1536 }
  0x14   :  { %s27_s24 = sshll.u32 %s564_s23, 4  ;;  %p512_p8 = scmp.ne.s32.totalorder %s640_s1, %s511_s27  ;;  %s28_s24 = int_to_ptr.vmem [resolvable:$true] %s27_s24 }
  0x15   :  { %p515_p9 = scmp.lt.u32.totalorder %s511_s27, %s640_s1 }
  0x17   :  { %p517_p10 = pnand %p515_p9, %p512_p8 }
  0x19   :  { %520 = shalt.err (!%p517_p10)
}
  0x1a   :  { %s521_s4 = scalar_lea.vmem %s28_s24, 1536  ;;  %p526_p12 = scmp.lt.s32.totalorder %s28_s24, %s28_s24 }
  0x1b   :  { %p522_p11 = scmp.ne.s32.totalorder %s28_s24, %s521_s4  ;;  %p527_p13 = scmp.lt.s32.totalorder %s521_s4, %s521_s4 }
  0x1d   :  { %p528_p0 = por %p527_p13, %p526_p12 }
  0x1f   :  { %p529_p1 = pnand %p528_p0, %p522_p11 }
  0x21   :  { %532 = shalt.err (!%p529_p1)
}
  0x22   :  { %33 = dma.hbm_to_vmem [thread:$0]  %s640_s1, 1536, %s28_s24, [#allocation6], %s562_s19, %s562_s19, %s563_s20  }
  0x23   :  { %555 = dma.done.wait [#allocation3], 256  }
  0x24   :  { %556 = vsyncadd [#allocation3], 4294967040 }
  0x25   :  { %557 = dma.done.wait [#allocation6], 1536  }
  0x26   :  { %558 = vsyncadd [#allocation6], 4294965760  ;;  %v42_v0 = vlaneseq  ;;  %v88_v6 = vld [vmem:[#allocation5] sm:$0xff]  ;;  %v89_v7 = vld [vmem:[#allocation5 + $0x8] sm:$0xff]  ;;  %vm109_vm1 = vcmask 261120   ;;  %s565_s1 = smov [#allocation7]  }
  0x27   :  { %v90_v8 = vld [vmem:[#allocation5 + $0x10] sm:$0xff]  ;;  %v464_v9 = vpack.c.bf16 %v89_v7, %v88_v6  ;;  %v91_v10 = vld [vmem:[#allocation5 + $0x18] sm:$0xff]  ;;  %v105_v18 = vld [vmem:[#allocation5 + $0x20] sm:$0xff]  ;;  %s386_s6 = sshll.u32 %s565_s1, 4  ;;  %s387_s6 = int_to_ptr.vmem [resolvable:$true] %s386_s6 }
  0x28   :  { %v43_v1 = vshrl.u32 %v42_v0, 7  ;;  %v40_v11 = vld [vmem:[#allocation2] sm:$0xff]  ;;  %v41_v12 = vld [vmem:[#allocation2 + $0x8] sm:$0xff]  ;;  %v468_v15 = vpack.c.bf16 %v91_v10, %v90_v8  ;;  %v106_v19 = vld [vmem:[#allocation5 + $0x28] sm:$0xff]  ;;  %s533_s7 = scalar_lea.vmem %s387_s6, 256  ;;  %p538_p3 = scmp.lt.s32.totalorder %s387_s6, %s387_s6 }
  0x29   :  { %v69_v16 = vrot.slane %v40_v11, 7  ;;  %v70_v17 = vrot.slane %v41_v12, 7  ;;  %v292_v20 = vld [vmem:[#allocation5 + $0x40] sm:$0xff]  ;;  %431 = vmatprep.mubr.msk.f32.mxu1 %vm109_vm1, %v40_v11  ;;  %v272_v21 = vrot.slane %v40_v11, 1  ;;  %465 = vmatprep.subr.bf16.mxu0 %v464_v9  ;;  %v456_v22 = vpack.c.bf16 %v106_v19, %v105_v18  ;;  %v293_v23 = vld [vmem:[#allocation5 + $0x48] sm:$0xff]  ;;  %v107_v24 = vld [vmem:[#allocation5 + $0x30] sm:$0xff]  ;;  %p534_p2 = scmp.ne.s32.totalorder %s387_s6, %s533_s7  ;;  %p539_p4 = scmp.lt.s32.totalorder %s533_s7, %s533_s7 }
  0x2a   :  { %v49_v2 = vand.u32 7, %v43_v1  ;;  %v44_v3 = vadd.s32 8, %v43_v1  ;;  %vm71_vm0 = vcmp.lt.s32.totalorder %v43_v1, 1  ;;  %v108_v25 = vld [vmem:[#allocation5 + $0x38] sm:$0xff]  ;;  %v273_v26 = vrot.slane %v41_v12, 1  ;;  %467 = vmatpush3.bf16.msra.mxu0 %v464_v9  ;;  %v294_v32 = vld [vmem:[#allocation5 + $0x50] sm:$0xff] }
  0x2b   :  { %vm274_vm3 = vcmp.lt.s32.totalorder %v43_v1, 7  ;;  %v73_v27 = vsel %vm71_vm0, %v70_v17, %v69_v16  ;;  %v460_v28 = vpack.c.bf16 %v108_v25, %v107_v24  ;;  %469 = vmatprep.subr.bf16.mxu0 %v468_v15  ;;  %457 = vmatprep.subr.bf16.mxu1 %v456_v22  ;;  %v72_v30 = vsel %vm71_vm0, %v69_v16, %v70_v17  ;;  %v295_v33 = vld [vmem:[#allocation5 + $0x58] sm:$0xff]  ;;  %p540_p5 = por %p539_p4, %p538_p3 }
  0x2c   :  { %v74_v4 = vadd.s32 4294967295, %v49_v2  ;;  %v56_v5 = vand.u32 7, %v44_v3  ;;  %v277_v14 = vadd.s32 1, %v49_v2  ;;  %v472_v31 = vpack.c.bf16 %v293_v23, %v292_v20  ;;  %459 = vmatpush3.bf16.msra.mxu1 %v456_v22 }
  0x2d   :  { %v275_v34 = vsel %vm274_vm3, %v272_v21, %v273_v26  ;;  %461 = vmatprep.subr.bf16.mxu1 %v460_v28  ;;  %v476_v36 = vpack.c.bf16 %v295_v33, %v294_v32  ;;  %v276_v39 = vsel %vm274_vm3, %v273_v26, %v272_v21  ;;  %p541_p6 = pnand %p540_p5, %p534_p2 }
  0x2e   :  { %vm76_vm2 = vcmp.ge.s32.totalorder %v74_v4, 0  ;;  %v75_v13 = vadd.s32 4294967295, %v56_v5  ;;  %vm281_vm5 = vcmp.lt.s32.totalorder %v277_v14, 8  ;;  %471 = vmatpush3.bf16.msra.mxu0 %v468_v15  ;;  %v278_v38 = vadd.s32 1, %v56_v5 }
  0x2f   :  { %v86_v29 = vsel %vm76_vm2, %v73_v27, 0.0  ;;  %473 = vmatprep.subr.bf16.mxu0 %v472_v31  ;;  %v289_v37 = vsel %vm281_vm5, %v275_v34, 0.0 }
  0x30   :  { %vm77_vm4 = vcmp.ge.s32.totalorder %v75_v13, 0  ;;  %442 = vmatprep.mubr.msk.f32.mxu0 %vm109_vm1, %v86_v29  ;;  %463 = vmatpush3.bf16.msra.mxu1 %v460_v28  ;;  %vm282_vm6 = vcmp.lt.s32.totalorder %v278_v38, 8 }
  0x31   :  { %v87_v35 = vsel %vm77_vm4, %v72_v30, 0.0  ;;  %v290_v40 = vsel %vm282_vm6, %v276_v39, 0.0 }
  0x32   :  { %443 = vmatmul.mubr.msk.f32.vlgmr.msra.gmra.mrb[0].mxu0 %vm109_vm1, %v87_v35 }
  0x33   :  { %475 = vmatpush3.bf16.msra.mxu0 %v472_v31  ;;  %453 = vmatprep.mubr.msk.f32.mxu0 %vm109_vm1, %v289_v37 }
  0x34   :  { %477 = vmatprep.subr.bf16.mxu0 %v476_v36  ;;  %432 = vmatmul.mubr.msk.f32.vlgmr.msra.gmra.mrb[0].mxu1 %vm109_vm1, %v41_v12 }
  0x37   :  { %479 = vmatpush3.bf16.msra.mxu0 %v476_v36 }
  0x3a   :  { %454 = vmatmul.mubr.msk.f32.vlgmr.msra.gmra.mrb[0].mxu0 %vm109_vm1, %v290_v40 }
 0x107   :  { %v433_v41 = vpop.f32.mrb[0].mxu1 }
 0x108   :  { %v182_v42 = vpop.f32.mrb[1].mxu1 }
 0x10d   :  { %v455_v43 = vpop.f32.mrb[0].mxu0 }
 0x10e   :  { %v480_v44 = vadd.f32 %v455_v43, %v433_v41  ;;  %v368_v45 = vpop.f32.mrb[1].mxu0 }
 0x10f   :  { %v481_v46 = vadd.f32 %v368_v45, %v182_v42 }
 0x110   :  { %380 = vst.msk [vmem:[#allocation7 + $0x8] sm:$0xff] %vm109_vm1, %v480_v44 }
 0x111   :  { %379 = vst.msk [vmem:[#allocation7] sm:$0xff] %vm109_vm1, %v481_v46 }
 0x112   :  { %544 = shalt.err (!%p541_p6)
}
 0x113   :  { %s545_s10 = scalar_lea.hbm %s641_s2, 256 }
 0x114   :  { %p546_p7 = scmp.ne.s32.totalorder %s641_s2, %s545_s10  ;;  %p549_p8 = scmp.lt.u32.totalorder %s545_s10, %s641_s2 }
 0x116   :  { %p551_p9 = pnand %p549_p8, %p546_p7 }
 0x118   :  { %554 = shalt.err (!%p551_p9)
}
 0x119   :  { %392 = dma.vmem_to_hbm [thread:$0]  %s387_s6, 256, %s641_s2, [#allocation4], %s562_s19, %s562_s19, %s563_s20  }
 0x11a   :  { %559 = dma.done.wait [#allocation4], 256  }
 0x11b   :  { %560 = vsyncadd [#allocation4], 4294967040 }
 0x11c   :  { %396 = vsyncpa [#allocation3], 1 }
 0x11d   :  { %397 = vsyncpa [#allocation6], 1 }
 0x11e   :  { %398 = vsyncpa [#allocation4], 1 }

</bundles_post_ra>
